<compile_context>
chip_gen: v5e
topology: v5e:2x2
jax: 0.10.0
libtpu: 0.0.40
codegen_flags: <defaults>
</compile_context>

<pallas_src>
import jax
import jax.numpy as jnp
from jax.experimental import pallas as pl
from jax.experimental.pallas import tpu as pltpu


def mlp_kernel(x_ref, w1_ref, b1_ref, w2_ref, b2_ref, wd_ref, bd_ref, o_ref):
    # fc1: cast the f32 x-tile to bf16 in-kernel (cheap VPU op hidden under the
    # MXU), MXU matmul with f32 accumulation; bias + ReLU in f32.
    x = x_ref[...].astype(w1_ref.dtype)
    h1 = jnp.dot(x, w1_ref[...], preferred_element_type=jnp.float32)
    h1 = jnp.maximum(h1 + b1_ref[...], 0.0)

    # fc2: bf16 MXU, f32 accumulation.
    h2 = jnp.dot(h1.astype(w2_ref.dtype), w2_ref[...],
                 preferred_element_type=jnp.float32)
    h2 = jnp.maximum(h2 + b2_ref[...], 0.0)

    # 2-class softmax tail: softmax(logits)[:, -1] == sigmoid(l1 - l0) with
    #   z = h2 @ (W3[:,1]-W3[:,0]) + (b3[1]-b3[0]).
    # Computed as wd @ h2^T so the batch ends up on the lane axis (lane-dense
    # store).  wd's 8 rows are identical replicas, so z's 8 rows are too.
    z = jnp.dot(wd_ref[...], h2.T, preferred_element_type=jnp.float32) + bd_ref[...]

    # Numerically-stable sigmoid: only exponentiate a non-positive argument
    # (no inf intermediates); exp and the reciprocal both run on the EUP.
    e = jnp.exp(-jnp.abs(z))
    r = pl.reciprocal(1.0 + e, approx=True)
    p = jnp.where(z >= 0.0, r, e * r)
    o_ref[0, :, :] = p.astype(o_ref.dtype)


def _pick_batch_tile(B, *, max_tile=2048, target_steps=4):
    """>= target_steps grid steps (2 per TensorCore on dual-TC v7x) so every core
    keeps a pipelined x-tile DMA; among those, the largest tile (per-step fixed
    overhead ~0.35us).  Prefer lane-aligned (multiple-of-128) tiles, then
    sublane-aligned (multiple-of-8)."""
    def best_multiple(q):
        best, t = 0, q
        while t <= min(max_tile, B):
            if B % t == 0 and B // t >= target_steps:
                best = t
            t += q
        return best

    tb = best_multiple(128) or best_multiple(8)
    if tb:
        return tb
    # Small batches: largest multiple-of-8 divisor (fewer steps), else B itself.
    top = min(max_tile, B) - (min(max_tile, B) % 8)
    for t in range(top, 7, -8):
        if B % t == 0:
            return t
    return B


def _vmem_limit_bytes(tb, d_in, hidden):
    """Footprint-derived VMEM limit: double-buffered weights/IO tiles + live f32
    intermediates, capped below the device's physical VMEM (~56 MiB ceiling on
    v7x, >100 MiB available on v5e/v6e)."""
    bf16, f32 = 2, 4
    weights = 2 * (d_in * hidden + hidden * hidden) * bf16      # W1, W2 (x2 buffers)
    smalls = 2 * (2 * hidden + 8 * hidden + 1) * f32            # b1, b2, w_diff, b_diff
    io = 2 * (tb * d_in * f32 + 8 * tb * f32)                   # x tile + out tile (x2)
    live = 3 * tb * hidden * f32                                # h1 / h2 / temporaries
    need = weights + smalls + io + live + (4 << 20)             # + compiler scratch slack
    try:
        cap = int(pltpu.get_tpu_info().vmem_capacity_bytes) * 7 // 8
    except Exception:  # query unavailable: assume the smallest VMEM (v7x, 64 MiB)
        cap = 56 << 20
    return int(min(max(need, 16 << 20), cap))


def prepare_params(w1, b1, w2, b2, w3, b3, *, use_bf16=True):
    """One-time conversion of PyTorch-layout params (weights stored [in, out],
    i.e. torch weight.T) into kernel operands.  Hoisted out of the per-call path
    so each forward never re-reads / re-casts the weights in HBM."""
    H = w1.shape[1]
    assert w3.shape[1] == 2, "this kernel implements the output_dim == 2 branch"
    cdt = jnp.bfloat16 if use_bf16 else jnp.float32
    w3f = w3.astype(jnp.float32)
    b3f = jnp.reshape(b3, (-1,)).astype(jnp.float32)
    # softmax(logits)[:, -1] with 2 classes == sigmoid(logit1 - logit0):
    w_diff = jnp.tile((w3f[:, 1] - w3f[:, 0]).reshape(1, H), (8, 1))  # 8 sublane replicas
    b_diff = (b3f[1] - b3f[0]).reshape(1, 1)
    return (w1.astype(cdt), jnp.reshape(b1, (1, H)).astype(jnp.float32),
            w2.astype(cdt), jnp.reshape(b2, (1, H)).astype(jnp.float32),
            w_diff, b_diff)


def predictor_mlp_forward(x, w1_c, b1_f, w2_c, b2_f, w_diff, b_diff, *, batch_tile=None):
    """x: [B, D_in] f32; remaining args from prepare_params().  Returns [B] f32."""
    B0, D_in = x.shape
    H = w1_c.shape[1]

    # Sublane-align the batch by padding rows (instead of an unaligned tile).
    # No-op for typical batch sizes.
    pad = (-B0) % 8
    if pad:
        x = jnp.pad(x, ((0, pad), (0, 0)))
    B = B0 + pad

    tb = batch_tile or _pick_batch_tile(B)
    assert B % tb == 0, "batch_tile must divide the (padded) batch"
    grid = B // tb

    out = pl.pallas_call(
        mlp_kernel,
        out_shape=jax.ShapeDtypeStruct((grid, 8, tb), jnp.float32),
        grid_spec=pltpu.PrefetchScalarGridSpec(
            num_scalar_prefetch=0,
            grid=(grid,),
            in_specs=[
                pl.BlockSpec((tb, D_in), lambda i: (i, 0)),  # x tile (f32, cast in-kernel)
                pl.BlockSpec((D_in, H), lambda i: (0, 0)),   # W1 (bf16)
                pl.BlockSpec((1, H), lambda i: (0, 0)),      # b1 (f32)
                pl.BlockSpec((H, H), lambda i: (0, 0)),      # W2 (bf16)
                pl.BlockSpec((1, H), lambda i: (0, 0)),      # b2 (f32)
                pl.BlockSpec((8, H), lambda i: (0, 0)),      # w_diff (f32, replicated rows)
                pl.BlockSpec((1, 1), lambda i: (0, 0)),      # b_diff (f32)
            ],
            out_specs=pl.BlockSpec((1, 8, tb), lambda i: (i, 0, 0)),
        ),
        compiler_params=pltpu.CompilerParams(
            dimension_semantics=("parallel",),               # shard batch steps across TCs
            vmem_limit_bytes=_vmem_limit_bytes(tb, D_in, H),
        ),
    )(x, w1_c, b1_f, w2_c, b2_f, w_diff, b_diff)

    # Sublane 0 of every block holds the probabilities (the 8 rows are replicas).
    return out[:, 0, :].reshape(B)[:B0]


def init_params(key, input_dim, hidden_dim, output_dim):
    """Deterministic PyTorch-Linear-style init: uniform(-1/sqrt(fan_in), +1/sqrt(fan_in))."""
    ks = jax.random.split(key, 6)

    def lin(kw, kb, fan_in, fan_out):
        bound = 1.0 / jnp.sqrt(fan_in)
        w = jax.random.uniform(kw, (fan_in, fan_out), jnp.float32, -bound, bound)
        b = jax.random.uniform(kb, (1, fan_out), jnp.float32, -bound, bound)
        return w, b

    w1, b1 = lin(ks[0], ks[1], input_dim, hidden_dim)
    w2, b2 = lin(ks[2], ks[3], hidden_dim, hidden_dim)
    w3, b3 = lin(ks[4], ks[5], hidden_dim, output_dim)
    return w1, b1, w2, b2, w3, b3


def reference_forward(x, w1, b1, w2, b2, w3, b3):
    """Full-f32 reference matching the PyTorch module exactly."""
    h1 = jnp.maximum(x @ w1 + b1, 0.0)
    h2 = jnp.maximum(h1 @ w2 + b2, 0.0)
    logits = h2 @ w3 + b3
    return jax.nn.softmax(logits, axis=1)[:, -1]


def reference_forward_matched(x, w1, b1, w2, b2, w3, b3, use_bf16=True):
    """Reference using the same bf16-MXU / f32-accumulation scheme as the kernel."""
    cdt = jnp.bfloat16 if use_bf16 else jnp.float32
    h1 = jnp.dot(x.astype(cdt), w1.astype(cdt), preferred_element_type=jnp.float32)
    h1 = jnp.maximum(h1 + b1.reshape(1, -1), 0.0)
    h2 = jnp.dot(h1.astype(cdt), w2.astype(cdt), preferred_element_type=jnp.float32)
    h2 = jnp.maximum(h2 + b2.reshape(1, -1), 0.0)
    w_diff = (w3[:, 1] - w3[:, 0]).astype(jnp.float32)
    b3f = jnp.reshape(b3, (-1,)).astype(jnp.float32)
    z = h2 @ w_diff + (b3f[1] - b3f[0])
    return jax.nn.sigmoid(z)


if __name__ == "__main__":
    # Small shapes consistent with the module.  B=512 -> tb=128 -> 4 "parallel"
    # grid steps: 2 per TensorCore on v7x, each with a pipelined x-tile DMA,
    # and a fully (8,128)-aligned lane-dense output tile.
    B, INPUT_DIM, HIDDEN_DIM, OUTPUT_DIM = 512, 32, 256, 2

    key = jax.random.PRNGKey(0)
    kx, kp = jax.random.split(key)
    x = jax.random.normal(kx, (B, INPUT_DIM), jnp.float32)
    raw = init_params(kp, INPUT_DIM, HIDDEN_DIM, OUTPUT_DIM)
    prepared = prepare_params(*raw)  # one-time weight cast / w_diff construction

    out = predictor_mlp_forward(x, *prepared)
    out = jax.block_until_ready(out)
    assert out.shape == (B,)

    # Tight check against a reference with identical bf16/f32 mixed precision.
    ref_m = reference_forward_matched(x, *raw)
    err_m = float(jnp.max(jnp.abs(out - ref_m)))
    assert jnp.allclose(out, ref_m, atol=5e-3, rtol=5e-3), err_m

    # Loose check against the exact f32 PyTorch semantics (bf16 weights ~1e-2 error).
    ref_f = reference_forward(x, *raw)
    err_f = float(jnp.max(jnp.abs(out - ref_f)))
    assert jnp.allclose(out, ref_f, atol=3e-2, rtol=0.0), err_f

    # TODO(synk): dropout branch (p=0.2, training mode) and the output_dim==1
    # branch are not implemented; the module defaults to dropout=False, output_dim=2.
    print("KERNEL_OK")
</pallas_src>

<mosaic_0001>
module attributes {stable_mosaic.version = 11 : i64} {
  func.func @mlp_kernel(%arg0: i32, %arg1: memref<128x32xf32, #tpu.memory_space<vmem>>, %arg2: memref<32x256xbf16, #tpu.memory_space<vmem>>, %arg3: memref<1x256xf32, #tpu.memory_space<vmem>>, %arg4: memref<256x256xbf16, #tpu.memory_space<vmem>>, %arg5: memref<1x256xf32, #tpu.memory_space<vmem>>, %arg6: memref<8x256xf32, #tpu.memory_space<vmem>>, %arg7: memref<1x1xf32, #tpu.memory_space<vmem>>, %arg8: memref<1x8x128xf32, #tpu.memory_space<vmem>>) attributes {dimension_semantics = [#tpu.dimension_semantics<parallel>], iteration_bounds = array<i64: 4>, scalar_prefetch = 0 : i64, scratch_operands = 0 : i64, tpu.core_type = #tpu.core_type<tc>, window_params = [{transform_indices = @transform_0, window_bounds = array<i64: 128, 32>}, {pipeline_mode = #tpu.pipeline_mode<synchronous>, transform_indices = @transform_1, window_bounds = array<i64: 32, 256>}, {pipeline_mode = #tpu.pipeline_mode<synchronous>, transform_indices = @transform_2, window_bounds = array<i64: 1, 256>}, {pipeline_mode = #tpu.pipeline_mode<synchronous>, transform_indices = @transform_3, window_bounds = array<i64: 256, 256>}, {pipeline_mode = #tpu.pipeline_mode<synchronous>, transform_indices = @transform_4, window_bounds = array<i64: 1, 256>}, {pipeline_mode = #tpu.pipeline_mode<synchronous>, transform_indices = @transform_5, window_bounds = array<i64: 8, 256>}, {pipeline_mode = #tpu.pipeline_mode<synchronous>, transform_indices = @transform_6, window_bounds = array<i64: 1, 1>}, {transform_indices = @transform_7, window_bounds = array<i64: 1, 8, 128>}]} {
    %c0 = arith.constant 0 : index
    %c0_0 = arith.constant 0 : index
    %0 = vector.load %arg1[%c0, %c0_0] : memref<128x32xf32, #tpu.memory_space<vmem>>, vector<128x32xf32>
    %1 = arith.truncf %0 : vector<128x32xf32> to vector<128x32xbf16>
    %c0_1 = arith.constant 0 : index
    %c0_2 = arith.constant 0 : index
    %2 = vector.load %arg2[%c0_1, %c0_2] : memref<32x256xbf16, #tpu.memory_space<vmem>>, vector<32x256xbf16>
    %cst = arith.constant dense<0.000000e+00> : vector<128x256xf32>
    %3 = tpu.matmul %1, %2, %cst {dimension_numbers = #tpu.dot_dimension_numbers<[1], [0], [0], [1], [0, 0, 1, 1], [], []>} : vector<128x32xbf16>, vector<32x256xbf16>, vector<128x256xf32> -> vector<128x256xf32>
    %c0_3 = arith.constant 0 : index
    %c0_4 = arith.constant 0 : index
    %4 = vector.load %arg3[%c0_3, %c0_4] : memref<1x256xf32, #tpu.memory_space<vmem>>, vector<1x256xf32>
    %5 = vector.broadcast %4 : vector<1x256xf32> to vector<128x256xf32>
    %6 = arith.addf %3, %5 : vector<128x256xf32>
    %cst_5 = arith.constant 0.000000e+00 : f32
    %7 = vector.broadcast %cst_5 : f32 to vector<128x256xf32>
    %8 = arith.maximumf %6, %7 : vector<128x256xf32>
    %9 = arith.truncf %8 : vector<128x256xf32> to vector<128x256xbf16>
    %c0_6 = arith.constant 0 : index
    %c0_7 = arith.constant 0 : index
    %10 = vector.load %arg4[%c0_6, %c0_7] : memref<256x256xbf16, #tpu.memory_space<vmem>>, vector<256x256xbf16>
    %cst_8 = arith.constant dense<0.000000e+00> : vector<128x256xf32>
    %11 = tpu.matmul %9, %10, %cst_8 {dimension_numbers = #tpu.dot_dimension_numbers<[1], [0], [0], [1], [0, 0, 1, 1], [], []>} : vector<128x256xbf16>, vector<256x256xbf16>, vector<128x256xf32> -> vector<128x256xf32>
    %c0_9 = arith.constant 0 : index
    %c0_10 = arith.constant 0 : index
    %12 = vector.load %arg5[%c0_9, %c0_10] : memref<1x256xf32, #tpu.memory_space<vmem>>, vector<1x256xf32>
    %13 = vector.broadcast %12 : vector<1x256xf32> to vector<128x256xf32>
    %14 = arith.addf %11, %13 : vector<128x256xf32>
    %cst_11 = arith.constant 0.000000e+00 : f32
    %15 = vector.broadcast %cst_11 : f32 to vector<128x256xf32>
    %16 = arith.maximumf %14, %15 : vector<128x256xf32>
    %c0_12 = arith.constant 0 : index
    %c0_13 = arith.constant 0 : index
    %17 = vector.load %arg6[%c0_12, %c0_13] : memref<8x256xf32, #tpu.memory_space<vmem>>, vector<8x256xf32>
    %18 = tpu.transpose %16, [1, 0] : vector<128x256xf32> -> vector<256x128xf32>
    %cst_14 = arith.constant dense<0.000000e+00> : vector<8x128xf32>
    %19 = tpu.matmul %17, %18, %cst_14 {dimension_numbers = #tpu.dot_dimension_numbers<[1], [0], [0], [1], [0, 0, 1, 1], [], []>} : vector<8x256xf32>, vector<256x128xf32>, vector<8x128xf32> -> vector<8x128xf32>
    %c0_15 = arith.constant 0 : index
    %c0_16 = arith.constant 0 : index
    %20 = vector.load %arg7[%c0_15, %c0_16] : memref<1x1xf32, #tpu.memory_space<vmem>>, vector<1x1xf32>
    %21 = vector.broadcast %20 : vector<1x1xf32> to vector<8x128xf32>
    %22 = arith.addf %19, %21 : vector<8x128xf32>
    %23 = math.absf %22 : vector<8x128xf32>
    %cst_17 = arith.constant 0.000000e+00 : f32
    %24 = vector.broadcast %cst_17 : f32 to vector<8x128xf32>
    %25 = arith.subf %24, %23 : vector<8x128xf32>
    %26 = math.exp %25 : vector<8x128xf32>
    %cst_18 = arith.constant 1.000000e+00 : f32
    %27 = vector.broadcast %cst_18 : f32 to vector<8x128xf32>
    %28 = arith.addf %27, %26 : vector<8x128xf32>
    %29 = tpu.reciprocal %28 {approx = true} : vector<8x128xf32> -> vector<8x128xf32>
    %cst_19 = arith.constant 0.000000e+00 : f32
    %30 = vector.broadcast %cst_19 : f32 to vector<8x128xf32>
    %31 = arith.cmpf oge, %22, %30 : vector<8x128xf32>
    %32 = arith.mulf %26, %29 : vector<8x128xf32>
    %33 = arith.select %31, %29, %32 : vector<8x128xi1>, vector<8x128xf32>
    %c0_20 = arith.constant 0 : index
    %c0_21 = arith.constant 0 : index
    %c0_22 = arith.constant 0 : index
    %34 = vector.load %arg8[%c0_20, %c0_21, %c0_22] : memref<1x8x128xf32, #tpu.memory_space<vmem>>, vector<1x8x128xf32>
    %35 = vector.shape_cast %34 : vector<1x8x128xf32> to vector<8x128xf32>
    %36 = vector.shape_cast %33 : vector<8x128xf32> to vector<1x8x128xf32>
    tpu.vector_store %arg8[%c0_20, %c0_21, %c0_22], %36 {strides = array<i32>} : memref<1x8x128xf32, #tpu.memory_space<vmem>>, vector<1x8x128xf32>,
    return
  }
  func.func @transform_0(%arg0: i32) -> (i32, i32) {
    %c0_i32 = arith.constant 0 : i32
    %c0_i32_0 = arith.constant 0 : i32
    return %arg0, %c0_i32 : i32, i32
  }
  func.func @transform_1(%arg0: i32) -> (i32, i32) {
    %c0_i32 = arith.constant 0 : i32
    %c0_i32_0 = arith.constant 0 : i32
    %c0_i32_1 = arith.constant 0 : i32
    return %c0_i32, %c0_i32_0 : i32, i32
  }
  func.func @transform_2(%arg0: i32) -> (i32, i32) {
    %c0_i32 = arith.constant 0 : i32
    %c0_i32_0 = arith.constant 0 : i32
    %c0_i32_1 = arith.constant 0 : i32
    return %c0_i32, %c0_i32_0 : i32, i32
  }
  func.func @transform_3(%arg0: i32) -> (i32, i32) {
    %c0_i32 = arith.constant 0 : i32
    %c0_i32_0 = arith.constant 0 : i32
    %c0_i32_1 = arith.constant 0 : i32
    return %c0_i32, %c0_i32_0 : i32, i32
  }
  func.func @transform_4(%arg0: i32) -> (i32, i32) {
    %c0_i32 = arith.constant 0 : i32
    %c0_i32_0 = arith.constant 0 : i32
    %c0_i32_1 = arith.constant 0 : i32
    return %c0_i32, %c0_i32_0 : i32, i32
  }
  func.func @transform_5(%arg0: i32) -> (i32, i32) {
    %c0_i32 = arith.constant 0 : i32
    %c0_i32_0 = arith.constant 0 : i32
    %c0_i32_1 = arith.constant 0 : i32
    return %c0_i32, %c0_i32_0 : i32, i32
  }
  func.func @transform_6(%arg0: i32) -> (i32, i32) {
    %c0_i32 = arith.constant 0 : i32
    %c0_i32_0 = arith.constant 0 : i32
    %c0_i32_1 = arith.constant 0 : i32
    return %c0_i32, %c0_i32_0 : i32, i32
  }
  func.func @transform_7(%arg0: i32) -> (i32, i32, i32) {
    %c0_i32 = arith.constant 0 : i32
    %c0_i32_0 = arith.constant 0 : i32
    %c0_i32_1 = arith.constant 0 : i32
    return %arg0, %c0_i32, %c0_i32_0 : i32, i32, i32
  }
}

</mosaic_0001>

<bundles_post_ra>
// kernel: tpu_custom_call.1
= control target key start
LH: loop header
LB: loop body
LE: loop exit
PB: predicated region body
PF: predicated region fallthrough
CT: control target
= control target key end

     0   :  { %s1913_s0 = inlined_call_operand.vmem [shape: f32[512,32], index: 0, kind: input, shape index: {}]   ;;  %s1914_s1 = inlined_call_operand.vmem [shape: bf16[32,256], index: 1, kind: input, shape index: {}]   ;;  %s1915_s2 = inlined_call_operand.vmem [shape: f32[1,256], index: 2, kind: input, shape index: {}]   ;;  %s1916_s3 = inlined_call_operand.vmem [shape: bf16[256,256], index: 3, kind: input, shape index: {}]   ;;  %s1917_s4 = inlined_call_operand.vmem [shape: f32[1,256], index: 4, kind: input, shape index: {}]   ;;  %s1918_s5 = inlined_call_operand.vmem [shape: f32[8,256], index: 5, kind: input, shape index: {}]   ;;  %s1919_s6 = inlined_call_operand.<no memory space> [shape: f32[1,1], index: 6, kind: input, shape index: {}]   ;;  %s1920_s7 = inlined_call_operand.hbm [shape: f32[4,8,128], index: 7, kind: output, shape index: {}]  }
   0x1   :  { %v12_v0 = vstv %s1919_s6 }
   0x2   :  { %13 = vst [vmem:[#allocation2] sm:$0x1] %v12_v0 }
   0x3   :  { %14 = vsyncpa [#allocation4], 0 }
   0x4   :  { %16 = vsyncpa [#allocation4 + $0x1], 0  ;;  %s1432_s26 = smov 0   ;;  %s1434_s27 = smov 0  }
   0x5   :  { %s1436_s28 = smov 0   ;;  %s1438_s29 = smov 0  }
   0x6 LB: > { %s1453_s6 = sadd.s32 4294967295, %s1386_s29   ;;  %s1067_s30 = sadd.s32 4294967294, %s1386_s29   ;;  %s1386_s29 = sphi %s1438_s29, %s1926_s29   ;;  %s1382_s28 = sphi %s1436_s28, %s1925_s28   ;;  %s1378_s27 = sphi %s1434_s27, %s1924_s27   ;;  %s1374_s26 = sphi %s1432_s26, %s1923_s26  }
   0x7   : > { %s1457_s8 = sadd.s32 1, %s1386_s29   ;;  %s181_s9 = sadd.s32 1, %s1382_s28 }
   0x8   : > { %s178_s10 = ssub.s32 %s1386_s29, %s1457_s8  ;;  %p191_p0 = scmp.ne.s32.totalorder %s1382_s28, %s1378_s27 }
   0x9   : > { %p179_p1 = scmp.eq.s32.totalorder %s178_s10, 0  ;;  %p192_p2 = scmp.eq.s32.totalorder %s1453_s6, 3 }
   0xa   : > { %p197_p3 = scmp.ne.s32.totalorder %s1378_s27, %s1374_s26  ;;  %p198_p4 = scmp.eq.s32.totalorder %s1067_s30, 3 }
   0xb   : > { %s1468_s11 = scalar_select %p179_p1, %s1382_s28, %s181_s9  }
   0xc   : > { %p1470_p5 = por %p192_p2, %p191_p0  ;;  %p1474_p6 = por %p198_p4, %p197_p3 }
   0xd   : > { %p1070_p7 = scmp.ge.s32.totalorder %s1386_s29, 1  ;;  %p243_p8 = scmp.lt.s32.totalorder %s1386_s29, 5 }
   0xf   : > { %p244_p9 = pnand %p1070_p7, %p243_p8 }
  0x10   : > { %s1072_s15 = sshll.u32 (!%p244_p9), %s1453_s6, 4  ;;  %s272_s25 = sand.u32 (!%p244_p9), 1, %s1378_s27  }
  0x11   : > { %247 = sbr.rel (%p244_p9) target bundleno = 657 (0x291), region = 48  ;;  %p276_p10 = scmp.lt.s32.totalorder (!%p244_p9), %s1072_s15, 63 }
  0x12   : > { %s1071_s30 = sshll.u32 (!%p244_p9), %s272_s25, 3  ;;  %s1235_s9 = sshll.u32 (!%p244_p9), %s1453_s6, 3 }
  0x13   : > { %s993_s18 = scalar_lea.sflag (!%p244_p9), [#allocation4], %s272_s25  ;;  %s1344_s23 = scalar_lea.hbm (!%p244_p9), %s1920_s7, 32 }
  0x16   : > { %v1084_v1 = vld [vmem:[%s1914_s1 + $0x10] sm:$0xf]  ;;  %v1241_v2 = vld [vmem:[%s1914_s1 + $0x14] sm:$0xf0]  ;;  %v1240_v3 = vld [vmem:[%s1914_s1 + $0x14] sm:$0xf] }
  0x17   : > { %v1085_v4 = vor.u32 %v1241_v2, %v1084_v1  ;;  %v1086_v5 = vld [vmem:[%s1914_s1 + $0x18] sm:$0xf0]  ;;  %v1076_v6 = vld [vmem:[%s1914_s1] sm:$0xf]  ;;  %v1239_v7 = vld [vmem:[%s1914_s1 + $0x4] sm:$0xf0] }
  0x18   : > { %v1089_v8 = vor.u32 %v1240_v3, %v1086_v5  ;;  %v1238_v9 = vld [vmem:[%s1914_s1 + $0x4] sm:$0xf]  ;;  %v1078_v10 = vld [vmem:[%s1914_s1 + $0x8] sm:$0xf0]  ;;  %v1077_v11 = vor.u32 %v1239_v7, %v1076_v6  ;;  %s1928_s15 = smov (!%p276_p10, %s1072_s15), 63  ;;  %vm336_vm0 = vcmask 261120  }
  0x19   : > { %367 = vmatpush.bf16.msra.mxu0 %v1085_v4  ;;  %1274 = vmatpush.bf16.msra.mxu2 %v1085_v4  ;;  %v1081_v12 = vor.u32 %v1238_v9, %v1078_v10  ;;  %s1073_s16 = sshll.u32 %s1928_s15, 3  ;;  %v1164_v25 = vld [vmem:[%s1916_s3 + $0x70] sm:$0xf]  ;;  %v1257_v26 = vld [vmem:[%s1916_s3 + $0x74] sm:$0xf0]  ;;  %s1003_s15 = scalar_lea.hbm %s1920_s7, %s1235_s9 }
  0x1a   : > { %416 = vmatpush.bf16.msra.mxu1 %v1089_v8  ;;  %1276 = vmatpush.bf16.msra.mxu3 %v1089_v8  ;;  %s1508_s19 = scalar_lea.vmem %s1913_s0, %s1073_s16  ;;  %v1228_v27 = vld [vmem:[%s1916_s3 + $0xf0] sm:$0xf]  ;;  %v1165_v28 = vor.u32 %v1257_v26, %v1164_v25  ;;  %v1273_v29 = vld [vmem:[%s1916_s3 + $0xf4] sm:$0xf0]  ;;  %v1256_v30 = vld [vmem:[%s1916_s3 + $0x74] sm:$0xf] }
  0x1b   : > { %v282_v13 = vld [vmem:[%s1508_s19] sm:$0xff]  ;;  %v283_v14 = vld [vmem:[%s1508_s19 + $0x8] sm:$0xff]  ;;  %v284_v16 = vld [vmem:[%s1508_s19 + $0x10] sm:$0xff]  ;;  %v1229_v32 = vor.u32 %v1273_v29, %v1228_v27  ;;  %s274_s16 = scalar_lea.vmem [#allocation3], %s1071_s30 }
  0x1c   : > { %v298_v15 = vpack.c.bf16 %v283_v14, %v282_v13  ;;  %v285_v17 = vld [vmem:[%s1508_s19 + $0x18] sm:$0xff]  ;;  %v286_v19 = vld [vmem:[%s1508_s19 + $0x20] sm:$0xff]  ;;  %v287_v20 = vld [vmem:[%s1508_s19 + $0x28] sm:$0xff]  ;;  %s1005_s17 = sshll.u32 %s274_s16, 4  ;;  %s1006_s17 = int_to_ptr.vmem [resolvable:$true] %s1005_s17 }
  0x1d   : > { %368 = vmatpush.bf16.msra.mxu0 %v1077_v11  ;;  %1275 = vmatpush.bf16.msra.mxu2 %v1077_v11  ;;  %v299_v18 = vpack.c.bf16 %v285_v17, %v284_v16  ;;  %v300_v21 = vpack.c.bf16 %v287_v20, %v286_v19  ;;  %v292_v22 = vld [vmem:[%s1508_s19 + $0x50] sm:$0xff]  ;;  %v293_v23 = vld [vmem:[%s1508_s19 + $0x58] sm:$0xff]  ;;  %v1156_v36 = vld [vmem:[%s1916_s3 + $0x60] sm:$0xf] }
  0x1e   : > { %417 = vmatpush.bf16.msra.mxu1 %v1081_v12  ;;  %1277 = vmatpush.bf16.msra.mxu3 %v1081_v12  ;;  %v303_v24 = vpack.c.bf16 %v293_v23, %v292_v22  ;;  %v1166_v31 = vld [vmem:[%s1916_s3 + $0x78] sm:$0xf0]  ;;  %v1272_v34 = vld [vmem:[%s1916_s3 + $0xf4] sm:$0xf]  ;;  %v1255_v38 = vld [vmem:[%s1916_s3 + $0x64] sm:$0xf0] }
  0x1f   : > { %v1169_v33 = vor.u32 %v1256_v30, %v1166_v31  ;;  %v1230_v35 = vld [vmem:[%s1916_s3 + $0xf8] sm:$0xf0]  ;;  %v1220_v39 = vld [vmem:[%s1916_s3 + $0xe0] sm:$0xf]  ;;  %v1271_v40 = vld [vmem:[%s1916_s3 + $0xe4] sm:$0xf0]  ;;  %v1157_v41 = vor.u32 %v1255_v38, %v1156_v36 }
  0x20   : > { %1090 = vmatmul.msk.bf16.vlgmr.msra.gmra.mxu0 %vm336_vm0, %v298_v15  ;;  %1095 = vmatmul.msk.bf16.vlgmr.msra.gmra.mxu2 %vm336_vm0, %v303_v24  ;;  %v1233_v37 = vor.u32 %v1272_v34, %v1230_v35  ;;  %v1221_v42 = vor.u32 %v1271_v40, %v1220_v39  ;;  %v1254_v43 = vld [vmem:[%s1916_s3 + $0x64] sm:$0xf]  ;;  %v1158_v44 = vld [vmem:[%s1916_s3 + $0x68] sm:$0xf0]  ;;  %v288_v46 = vld [vmem:[%s1508_s19 + $0x30] sm:$0xff] }
  0x21   : > { %1098 = vmatmul.msk.bf16.vlgmr.msra.gmra.mxu1 %vm336_vm0, %v298_v15  ;;  %1103 = vmatmul.msk.bf16.vlgmr.msra.gmra.mxu3 %vm336_vm0, %v303_v24  ;;  %v1270_v45 = vld [vmem:[%s1916_s3 + $0xe4] sm:$0xf]  ;;  %v289_v47 = vld [vmem:[%s1508_s19 + $0x38] sm:$0xff]  ;;  %v1161_v48 = vor.u32 %v1254_v43, %v1158_v44  ;;  %v1222_v49 = vld [vmem:[%s1916_s3 + $0xe8] sm:$0xf0] }
  0x22   : > { %705 = vmatpush.bf16.msrb.mxu2 %v1165_v28  ;;  %754 = vmatpush.bf16.msrb.mxu3 %v1229_v32  ;;  %v1148_v50 = vld [vmem:[%s1916_s3 + $0x50] sm:$0xf]  ;;  %v1253_v51 = vld [vmem:[%s1916_s3 + $0x54] sm:$0xf0]  ;;  %v1225_v52 = vor.u32 %v1270_v45, %v1222_v49  ;;  %v1252_v55 = vld [vmem:[%s1916_s3 + $0x54] sm:$0xf]  ;;  %v301_v4 = vpack.c.bf16 %v289_v47, %v288_v46 }
  0x23   : > { %803 = vmatpush.bf16.msrb.mxu0 %v1169_v33  ;;  %852 = vmatpush.bf16.msrb.mxu1 %v1233_v37  ;;  %v1212_v53 = vld [vmem:[%s1916_s3 + $0xd0] sm:$0xf]  ;;  %v1269_v54 = vld [vmem:[%s1916_s3 + $0xd4] sm:$0xf0]  ;;  %v1149_v56 = vor.u32 %v1253_v51, %v1148_v50  ;;  %v1150_v57 = vld [vmem:[%s1916_s3 + $0x58] sm:$0xf0] }
  0x24   : > { %v1268_v58 = vld [vmem:[%s1916_s3 + $0xd4] sm:$0xf]  ;;  %v1214_v59 = vld [vmem:[%s1916_s3 + $0xd8] sm:$0xf0]  ;;  %v1213_v60 = vor.u32 %v1269_v54, %v1212_v53  ;;  %v1153_v61 = vor.u32 %v1252_v55, %v1150_v57  ;;  %v1140_v62 = vld [vmem:[%s1916_s3 + $0x40] sm:$0xf] }
  0x25   : > { %v1251_v63 = vld [vmem:[%s1916_s3 + $0x44] sm:$0xf0]  ;;  %v294_v0 = vld [vmem:[%s1508_s19 + $0x60] sm:$0xff]  ;;  %v1217_v2 = vor.u32 %v1268_v58, %v1214_v59  ;;  %v1142_v7 = vld [vmem:[%s1916_s3 + $0x48] sm:$0xf0] }
  0x26   : > { %706 = vmatpush.bf16.msrb.mxu2 %v1157_v41  ;;  %755 = vmatpush.bf16.msrb.mxu3 %v1221_v42  ;;  %v295_v1 = vld [vmem:[%s1508_s19 + $0x68] sm:$0xff]  ;;  %v1204_v3 = vld [vmem:[%s1916_s3 + $0xc0] sm:$0xf]  ;;  %v1250_v6 = vld [vmem:[%s1916_s3 + $0x44] sm:$0xf]  ;;  %v1141_v8 = vor.u32 %v1251_v63, %v1140_v62 }
  0x27   : > { %804 = vmatpush.bf16.msrb.mxu0 %v1161_v48  ;;  %853 = vmatpush.bf16.msrb.mxu1 %v1225_v52  ;;  %v1267_v5 = vld [vmem:[%s1916_s3 + $0xc4] sm:$0xf0]  ;;  %v1266_v9 = vld [vmem:[%s1916_s3 + $0xc4] sm:$0xf]  ;;  %v1206_v10 = vld [vmem:[%s1916_s3 + $0xc8] sm:$0xf0]  ;;  %v304_v11 = vpack.c.bf16 %v295_v1, %v294_v0  ;;  %v1145_v13 = vor.u32 %v1250_v6, %v1142_v7 }
  0x28   : > { %v1205_v12 = vor.u32 %v1267_v5, %v1204_v3  ;;  %v1209_v14 = vor.u32 %v1266_v9, %v1206_v10  ;;  %v290_v15 = vld [vmem:[%s1508_s19 + $0x40] sm:$0xff]  ;;  %v291_v16 = vld [vmem:[%s1508_s19 + $0x48] sm:$0xff]  ;;  %v296_v17 = vld [vmem:[%s1508_s19 + $0x70] sm:$0xff] }
  0x29   : > { %v302_v19 = vpack.c.bf16 %v291_v16, %v290_v15  ;;  %v1249_v22 = vld [vmem:[%s1916_s3 + $0x34] sm:$0xf0]  ;;  %v1196_v23 = vld [vmem:[%s1916_s3 + $0xb0] sm:$0xf]  ;;  %v1248_v26 = vld [vmem:[%s1916_s3 + $0x34] sm:$0xf] }
  0x2a   : > { %707 = vmatpush.bf16.msrb.mxu2 %v1149_v56  ;;  %756 = vmatpush.bf16.msrb.mxu3 %v1213_v60  ;;  %v1265_v25 = vld [vmem:[%s1916_s3 + $0xb4] sm:$0xf0]  ;;  %v1134_v27 = vld [vmem:[%s1916_s3 + $0x38] sm:$0xf0]  ;;  %v1264_v30 = vld [vmem:[%s1916_s3 + $0xb4] sm:$0xf] }
  0x2b   : > { %805 = vmatpush.bf16.msrb.mxu0 %v1153_v61  ;;  %854 = vmatpush.bf16.msrb.mxu1 %v1217_v2  ;;  %v1197_v28 = vor.u32 %v1265_v25, %v1196_v23  ;;  %v1137_v29 = vor.u32 %v1248_v26, %v1134_v27  ;;  %v1198_v31 = vld [vmem:[%s1916_s3 + $0xb8] sm:$0xf0]  ;;  %v1124_v33 = vld [vmem:[%s1916_s3 + $0x20] sm:$0xf]  ;;  %v1247_v34 = vld [vmem:[%s1916_s3 + $0x24] sm:$0xf0] }
  0x2c   : > { %v1201_v32 = vor.u32 %v1264_v30, %v1198_v31  ;;  %v1125_v35 = vor.u32 %v1247_v34, %v1124_v33  ;;  %v1188_v36 = vld [vmem:[%s1916_s3 + $0xa0] sm:$0xf]  ;;  %v1263_v37 = vld [vmem:[%s1916_s3 + $0xa4] sm:$0xf0]  ;;  %v1246_v38 = vld [vmem:[%s1916_s3 + $0x24] sm:$0xf] }
  0x2d   : > { %v1189_v39 = vor.u32 %v1263_v37, %v1188_v36  ;;  %v1126_v40 = vld [vmem:[%s1916_s3 + $0x28] sm:$0xf0]  ;;  %v1262_v41 = vld [vmem:[%s1916_s3 + $0xa4] sm:$0xf]  ;;  %v1116_v45 = vld [vmem:[%s1916_s3 + $0x10] sm:$0xf] }
  0x2e   : > { %708 = vmatpush.bf16.msrb.mxu2 %v1141_v8  ;;  %757 = vmatpush.bf16.msrb.mxu3 %v1205_v12  ;;  %v1190_v42 = vld [vmem:[%s1916_s3 + $0xa8] sm:$0xf0]  ;;  %v1129_v43 = vor.u32 %v1246_v38, %v1126_v40  ;;  %v1245_v46 = vld [vmem:[%s1916_s3 + $0x14] sm:$0xf0]  ;;  %v1180_v47 = vld [vmem:[%s1916_s3 + $0x90] sm:$0xf] }
  0x2f   : > { %806 = vmatpush.bf16.msrb.mxu0 %v1145_v13  ;;  %855 = vmatpush.bf16.msrb.mxu1 %v1209_v14  ;;  %v1193_v44 = vor.u32 %v1262_v41, %v1190_v42  ;;  %v1117_v48 = vor.u32 %v1245_v46, %v1116_v45  ;;  %v1261_v49 = vld [vmem:[%s1916_s3 + $0x94] sm:$0xf0]  ;;  %v1244_v50 = vld [vmem:[%s1916_s3 + $0x14] sm:$0xf]  ;;  %v1118_v51 = vld [vmem:[%s1916_s3 + $0x18] sm:$0xf0] }
  0x30   : > { %1091 = vmatmul.msk.bf16.gmra.mxu0 %vm336_vm0, %v299_v18  ;;  %1096 = vmatmul.msk.bf16.gmra.mxu2 %vm336_vm0, %v304_v11  ;;  %v1181_v52 = vor.u32 %v1261_v49, %v1180_v47  ;;  %v1121_v53 = vor.u32 %v1244_v50, %v1118_v51  ;;  %v1260_v54 = vld [vmem:[%s1916_s3 + $0x94] sm:$0xf]  ;;  %v1182_v55 = vld [vmem:[%s1916_s3 + $0x98] sm:$0xf0]  ;;  %v1108_v57 = vld [vmem:[%s1916_s3] sm:$0xf] }
  0x31   : > { %1099 = vmatmul.msk.bf16.gmra.mxu1 %vm336_vm0, %v299_v18  ;;  %1104 = vmatmul.msk.bf16.gmra.mxu3 %vm336_vm0, %v304_v11  ;;  %v297_v18 = vld [vmem:[%s1508_s19 + $0x78] sm:$0xff]  ;;  %v1185_v56 = vor.u32 %v1260_v54, %v1182_v55  ;;  %v1243_v58 = vld [vmem:[%s1916_s3 + $0x4] sm:$0xf0]  ;;  %v1172_v59 = vld [vmem:[%s1916_s3 + $0x80] sm:$0xf]  ;;  %s1007_s19 = sshll.u32 %s1003_s15, 4  ;;  %s1008_s19 = int_to_ptr.hbm [resolvable:$true] %s1007_s19 }
  0x32   : > { %v305_v20 = vpack.c.bf16 %v297_v18, %v296_v17  ;;  %758 = vmatpush.bf16.msrb.mxu3 %v1197_v28  ;;  %v1109_v60 = vor.u32 %v1243_v58, %v1108_v57  ;;  %v1259_v61 = vld [vmem:[%s1916_s3 + $0x84] sm:$0xf0]  ;;  %v1242_v62 = vld [vmem:[%s1916_s3 + $0x4] sm:$0xf]  ;;  %v1110_v63 = vld [vmem:[%s1916_s3 + $0x8] sm:$0xf0] }
  0x33   : > { %807 = vmatpush.bf16.msrb.mxu0 %v1137_v29  ;;  %856 = vmatpush.bf16.msrb.mxu1 %v1201_v32  ;;  %v1173_v0 = vor.u32 %v1259_v61, %v1172_v59  ;;  %v1113_v1 = vor.u32 %v1242_v62, %v1110_v63  ;;  %v1258_v2 = vld [vmem:[%s1916_s3 + $0x84] sm:$0xf]  ;;  %v1174_v3 = vld [vmem:[%s1916_s3 + $0x88] sm:$0xf0]  ;;  %v310_v5 = vld [vmem:[%s1915_s2] sm:$0x3] }
  0x34   : > { %v1737_v8 = vperm.slane %v310_v5, 0  ;;  %v1739_v9 = vperm.slane %v310_v5, 1  ;;  %s1338_s20 = sshra.s32 %s1008_s19, 4  ;;  %s1339_s20 = int_to_ptr.hbm [resolvable:$true] %s1338_s20 }
  0x35   : > { %s1340_s6 = scalar_lea.hbm %s1339_s20, 8  ;;  %p1345_p0 = scmp.lt.s32.totalorder %s1339_s20, %s1920_s7 }
  0x36   : > { %759 = vmatpush.bf16.msrb.mxu3 %v1189_v39  ;;  %p1341_p11 = scmp.ne.s32.totalorder %s1339_s20, %s1340_s6  ;;  %p1346_p1 = scmp.lt.s32.totalorder %s1344_s23, %s1340_s6 }
  0x37   : > { %808 = vmatpush.bf16.msrb.mxu0 %v1129_v43  ;;  %857 = vmatpush.bf16.msrb.mxu1 %v1193_v44 }
  0x38   : > { %p1342_p12 = pnand %p1341_p11, %p1470_p5  ;;  %p1347_p2 = por %p1346_p1, %p1345_p0 }
  0x3a   : > { %760 = vmatpush.bf16.msrb.mxu3 %v1181_v52  ;;  %p1343_p13 = pneg %p1342_p12 }
  0x3b   : > { %809 = vmatpush.bf16.msrb.mxu0 %v1121_v53  ;;  %858 = vmatpush.bf16.msrb.mxu1 %v1185_v56 }
  0x3c   : > { %p1348_p3 = pnand %p1347_p2, %p1343_p13 }
  0x3e   : > { %761 = vmatpush.bf16.msrb.mxu3 %v1173_v0 }
  0x3f   : > { %810 = vmatpush.bf16.msrb.mxu0 %v1113_v1 }
  0x40   : > { %1092 = vmatmul.msk.bf16.gmra.mxu0 %vm336_vm0, %v300_v21  ;;  %1097 = vmatmul.msk.bf16.gmra.mxu2 %vm336_vm0, %v305_v20 }
  0x41   : > { %1100 = vmatmul.msk.bf16.gmra.mxu1 %vm336_vm0, %v300_v21  ;;  %1105 = vmatmul.msk.bf16.gmra.mxu3 %vm336_vm0, %v305_v20  ;;  %v1132_v21 = vld [vmem:[%s1916_s3 + $0x30] sm:$0xf] }
  0x42   : > { %v1133_v24 = vor.u32 %v1249_v22, %v1132_v21 }
  0x44   : > { %709 = vmatpush.bf16.msrb.mxu2 %v1133_v24 }
  0x48   : > { %710 = vmatpush.bf16.msrb.mxu2 %v1125_v35 }
  0x4c   : > { %711 = vmatpush.bf16.msrb.mxu2 %v1117_v48 }
  0x50   : > { %1093 = vmatmul.msk.bf16.gmra.mxu0 %vm336_vm0, %v301_v4  ;;  %712 = vmatpush.bf16.msrb.mxu2 %v1109_v60 }
  0x51   : > { %1101 = vmatmul.msk.bf16.gmra.mxu1 %vm336_vm0, %v301_v4  ;;  %v1177_v4 = vor.u32 %v1258_v2, %v1174_v3 }
  0x53   : > { %859 = vmatpush.bf16.msrb.mxu1 %v1177_v4 }
  0x60   : > { %1094 = vmatmul.msk.bf16.gmra.mxu0 %vm336_vm0, %v302_v19 }
  0x61   : > { %1102 = vmatmul.msk.bf16.gmra.mxu1 %vm336_vm0, %v302_v19 }
  0x9d   : > { %v370_v6 = vpop.f32.mrf.mxu0 }
  0x9e   : > { %v419_v7 = vpop.f32.mrf.mxu1  ;;  %v371_v10 = vadd.f32 %v370_v6, %v1737_v8 }
  0x9f   : > { %v420_v11 = vadd.f32 %v419_v7, %v1739_v9 }
  0xa0   : > { %v459_v16 = vmax.f32 %v371_v10, 0.0 }
  0xa1   : > { %v460_v17 = vmax.f32 %v420_v11, 0.0 }
  0xa3   : > { %v395_v0 = vpop.f32.mrf.mxu2 }
  0xa4   : > { %v444_v1 = vpop.f32.mrf.mxu3 }
  0xa5   : > { %v372_v12 = vpop.f32.mrf.mxu0 }
  0xa6   : > { %v421_v13 = vpop.f32.mrf.mxu1  ;;  %v373_v14 = vadd.f32 %v372_v12, %v1737_v8 }
  0xa7   : > { %v422_v15 = vadd.f32 %v421_v13, %v1739_v9 }
  0xa8   : > { %v461_v18 = vmax.f32 %v373_v14, 0.0 }
  0xa9   : > { %v462_v19 = vmax.f32 %v422_v15, 0.0 }
  0xaa   : > { %v491_v20 = vpack.c.bf16 %v461_v18, %v459_v16 }
  0xab   : > { %v492_v21 = vpack.c.bf16 %v462_v19, %v460_v17  ;;  %v397_v12 = vpop.f32.mrf.mxu2 }
  0xac   : > { %713 = vmatmul.bf16.vlgmr.msrb.gmra.mxu2 %v491_v20  ;;  %811 = vmatmul.bf16.vlgmr.msrb.gmra.mxu0 %v491_v20  ;;  %v446_v13 = vpop.f32.mrf.mxu3 }
  0xad   : > { %762 = vmatmul.bf16.vlgmr.msrb.gmra.mxu3 %v492_v21  ;;  %860 = vmatmul.bf16.vlgmr.msrb.gmra.mxu1 %v492_v21  ;;  %v375_v22 = vpop.f32.mrf.mxu0 }
  0xae   : > { %v424_v23 = vpop.f32.mrf.mxu1  ;;  %v376_v24 = vadd.f32 %v375_v22, %v1737_v8  ;;  %v396_v22 = vadd.f32 %v395_v0, %v1737_v8 }
  0xaf   : > { %v425_v25 = vadd.f32 %v424_v23, %v1739_v9  ;;  %v445_v23 = vadd.f32 %v444_v1, %v1739_v9 }
  0xb0   : > { %v463_v30 = vmax.f32 %v376_v24, 0.0  ;;  %v398_v24 = vadd.f32 %v397_v12, %v1737_v8 }
  0xb1   : > { %v464_v31 = vmax.f32 %v425_v25, 0.0  ;;  %v447_v25 = vadd.f32 %v446_v13, %v1739_v9 }
  0xb3   : > { %v400_v20 = vpop.f32.mrf.mxu2 }
  0xb4   : > { %v449_v21 = vpop.f32.mrf.mxu3 }
  0xb5   : > { %v377_v26 = vpop.f32.mrf.mxu0 }
  0xb6   : > { %v426_v27 = vpop.f32.mrf.mxu1  ;;  %v378_v28 = vadd.f32 %v377_v26, %v1737_v8  ;;  %v479_v26 = vmax.f32 %v396_v22, 0.0 }
  0xb7   : > { %v427_v29 = vadd.f32 %v426_v27, %v1739_v9  ;;  %v480_v27 = vmax.f32 %v445_v23, 0.0 }
  0xb8   : > { %v465_v32 = vmax.f32 %v378_v28, 0.0  ;;  %v481_v28 = vmax.f32 %v398_v24, 0.0 }
  0xb9   : > { %v466_v33 = vmax.f32 %v427_v29, 0.0  ;;  %v482_v29 = vmax.f32 %v447_v25, 0.0 }
  0xba   : > { %v493_v34 = vpack.c.bf16 %v465_v32, %v463_v30  ;;  %v501_v30 = vpack.c.bf16 %v481_v28, %v479_v26 }
  0xbb   : > { %v494_v35 = vpack.c.bf16 %v466_v33, %v464_v31  ;;  %v502_v31 = vpack.c.bf16 %v482_v29, %v480_v27  ;;  %v402_v32 = vpop.f32.mrf.mxu2 }
  0xbc   : > { %718 = vmatmul.bf16.gmra.mxu2 %v493_v34  ;;  %816 = vmatmul.bf16.gmra.mxu0 %v493_v34  ;;  %v451_v33 = vpop.f32.mrf.mxu3  ;;  %v401_v34 = vadd.f32 %v400_v20, %v1737_v8 }
  0xbd   : > { %767 = vmatmul.bf16.gmra.mxu3 %v494_v35  ;;  %865 = vmatmul.bf16.gmra.mxu1 %v494_v35  ;;  %v380_v36 = vpop.f32.mrf.mxu0  ;;  %v450_v35 = vadd.f32 %v449_v21, %v1739_v9 }
  0xbe   : > { %v429_v37 = vpop.f32.mrf.mxu1  ;;  %v381_v38 = vadd.f32 %v380_v36, %v1737_v8  ;;  %v403_v36 = vadd.f32 %v402_v32, %v1737_v8 }
  0xbf   : > { %v430_v39 = vadd.f32 %v429_v37, %v1739_v9  ;;  %v452_v37 = vadd.f32 %v451_v33, %v1739_v9 }
  0xc0   : > { %v467_v44 = vmax.f32 %v381_v38, 0.0 }
  0xc1   : > { %v468_v45 = vmax.f32 %v430_v39, 0.0 }
  0xc3   : > { %v405_v38 = vpop.f32.mrf.mxu2 }
  0xc4   : > { %v454_v39 = vpop.f32.mrf.mxu3 }
  0xc5   : > { %v382_v40 = vpop.f32.mrf.mxu0 }
  0xc6   : > { %v431_v41 = vpop.f32.mrf.mxu1  ;;  %v383_v42 = vadd.f32 %v382_v40, %v1737_v8  ;;  %v483_v40 = vmax.f32 %v401_v34, 0.0 }
  0xc7   : > { %v432_v43 = vadd.f32 %v431_v41, %v1739_v9  ;;  %v484_v41 = vmax.f32 %v450_v35, 0.0 }
  0xc8   : > { %v469_v46 = vmax.f32 %v383_v42, 0.0  ;;  %v485_v42 = vmax.f32 %v403_v36, 0.0 }
  0xc9   : > { %v470_v47 = vmax.f32 %v432_v43, 0.0  ;;  %v486_v43 = vmax.f32 %v452_v37, 0.0 }
  0xca   : > { %v495_v48 = vpack.c.bf16 %v469_v46, %v467_v44  ;;  %v503_v44 = vpack.c.bf16 %v485_v42, %v483_v40 }
  0xcb   : > { %v496_v49 = vpack.c.bf16 %v470_v47, %v468_v45  ;;  %v504_v45 = vpack.c.bf16 %v486_v43, %v484_v41  ;;  %v407_v46 = vpop.f32.mrf.mxu2 }
  0xcc   : > { %723 = vmatmul.bf16.gmra.mxu2 %v495_v48  ;;  %821 = vmatmul.bf16.gmra.mxu0 %v495_v48  ;;  %v456_v47 = vpop.f32.mrf.mxu3  ;;  %v406_v48 = vadd.f32 %v405_v38, %v1737_v8 }
  0xcd   : > { %772 = vmatmul.bf16.gmra.mxu3 %v496_v49  ;;  %870 = vmatmul.bf16.gmra.mxu1 %v496_v49  ;;  %v385_v50 = vpop.f32.mrf.mxu0  ;;  %v455_v49 = vadd.f32 %v454_v39, %v1739_v9 }
  0xce   : > { %v434_v51 = vpop.f32.mrf.mxu1  ;;  %v386_v52 = vadd.f32 %v385_v50, %v1737_v8  ;;  %v408_v50 = vadd.f32 %v407_v46, %v1737_v8 }
  0xcf   : > { %v435_v53 = vadd.f32 %v434_v51, %v1739_v9  ;;  %v457_v51 = vadd.f32 %v456_v47, %v1739_v9 }
  0xd0   : > { %v471_v58 = vmax.f32 %v386_v52, 0.0  ;;  %v487_v52 = vmax.f32 %v406_v48, 0.0 }
  0xd1   : > { %v472_v59 = vmax.f32 %v435_v53, 0.0  ;;  %v488_v53 = vmax.f32 %v455_v49, 0.0 }
  0xd5   : > { %v387_v54 = vpop.f32.mrf.mxu0 }
  0xd6   : > { %v436_v55 = vpop.f32.mrf.mxu1  ;;  %v388_v56 = vadd.f32 %v387_v54, %v1737_v8  ;;  %v489_v54 = vmax.f32 %v408_v50, 0.0 }
  0xd7   : > { %v437_v57 = vadd.f32 %v436_v55, %v1739_v9  ;;  %v490_v55 = vmax.f32 %v457_v51, 0.0 }
  0xd8   : > { %v473_v60 = vmax.f32 %v388_v56, 0.0  ;;  %v505_v56 = vpack.c.bf16 %v489_v54, %v487_v52 }
  0xd9   : > { %v474_v61 = vmax.f32 %v437_v57, 0.0  ;;  %v506_v57 = vpack.c.bf16 %v490_v55, %v488_v53 }
  0xda   : > { %v497_v62 = vpack.c.bf16 %v473_v60, %v471_v58  ;;  %v539_v58 = vld [vmem:[%s1917_s4] sm:$0x3] }
  0xdb   : > { %v498_v63 = vpack.c.bf16 %v474_v61, %v472_v59  ;;  %v1776_v59 = vperm.slane %v539_v58, 1  ;;  %v1779_v61 = vperm.slane %v539_v58, 0 }
  0xdc   : > { %728 = vmatmul.bf16.gmra.mxu2 %v497_v62  ;;  %826 = vmatmul.bf16.gmra.mxu0 %v497_v62 }
  0xdd   : > { %777 = vmatmul.bf16.gmra.mxu3 %v498_v63  ;;  %875 = vmatmul.bf16.gmra.mxu1 %v498_v63  ;;  %v390_v2 = vpop.f32.mrf.mxu0 }
  0xde   : > { %v439_v3 = vpop.f32.mrf.mxu1  ;;  %v391_v4 = vadd.f32 %v390_v2, %v1737_v8 }
  0xdf   : > { %v440_v5 = vadd.f32 %v439_v3, %v1739_v9 }
  0xe0   : > { %v475_v14 = vmax.f32 %v391_v4, 0.0 }
  0xe1   : > { %v476_v15 = vmax.f32 %v440_v5, 0.0 }
  0xe5   : > { %v392_v6 = vpop.f32.mrf.mxu0 }
  0xe6   : > { %v441_v7 = vpop.f32.mrf.mxu1  ;;  %v393_v10 = vadd.f32 %v392_v6, %v1737_v8 }
  0xe7   : > { %v442_v11 = vadd.f32 %v441_v7, %v1739_v9 }
  0xe8   : > { %v477_v16 = vmax.f32 %v393_v10, 0.0 }
  0xe9   : > { %v478_v17 = vmax.f32 %v442_v11, 0.0 }
  0xea   : > { %v499_v18 = vpack.c.bf16 %v477_v16, %v475_v14 }
  0xeb   : > { %v500_v19 = vpack.c.bf16 %v478_v17, %v476_v15 }
  0xec   : > { %733 = vmatmul.bf16.gmra.mxu2 %v499_v18  ;;  %831 = vmatmul.bf16.gmra.mxu0 %v499_v18 }
  0xed   : > { %782 = vmatmul.bf16.gmra.mxu3 %v500_v19  ;;  %880 = vmatmul.bf16.gmra.mxu1 %v500_v19 }
  0xfc   : > { %738 = vmatmul.bf16.gmra.mxu2 %v501_v30  ;;  %836 = vmatmul.bf16.gmra.mxu0 %v501_v30 }
  0xfd   : > { %787 = vmatmul.bf16.gmra.mxu3 %v502_v31  ;;  %885 = vmatmul.bf16.gmra.mxu1 %v502_v31 }
 0x10c   : > { %743 = vmatmul.bf16.gmra.mxu2 %v503_v44  ;;  %841 = vmatmul.bf16.gmra.mxu0 %v503_v44 }
 0x10d   : > { %792 = vmatmul.bf16.gmra.mxu3 %v504_v45  ;;  %890 = vmatmul.bf16.gmra.mxu1 %v504_v45 }
 0x11c   : > { %748 = vmatmul.bf16.gmra.mxu2 %v505_v56  ;;  %846 = vmatmul.bf16.gmra.mxu0 %v505_v56 }
 0x11d   : > { %797 = vmatmul.bf16.gmra.mxu3 %v506_v57  ;;  %895 = vmatmul.bf16.gmra.mxu1 %v506_v57 }
 0x129   : > { %v812_v60 = vpop.f32.mrf.mxu0 }
 0x12a   : > { %v861_v8 = vpop.f32.mrf.mxu1  ;;  %v813_v9 = vadd.f32 %v812_v60, %v1776_v59 }
 0x12c   : > { %v1781_v62 = vadd.f32 %v861_v8, %v813_v9 }
 0x12f   : > { %v714_v63 = vpop.f32.mrf.mxu2 }
 0x130   : > { %v763_v0 = vpop.f32.mrf.mxu3  ;;  %v715_v1 = vadd.f32 %v714_v63, %v1779_v61 }
 0x131   : > { %v814_v3 = vpop.f32.mrf.mxu0 }
 0x132   : > { %v1784_v2 = vadd.f32 %v763_v0, %v715_v1  ;;  %v863_v4 = vpop.f32.mrf.mxu1  ;;  %v815_v5 = vadd.f32 %v814_v3, %v1776_v59 }
 0x134   : > { %v1787_v6 = vadd.f32 %v863_v4, %v815_v5 }
 0x137   : > { %v716_v7 = vpop.f32.mrf.mxu2 }
 0x138   : > { %v765_v10 = vpop.f32.mrf.mxu3  ;;  %v717_v11 = vadd.f32 %v716_v7, %v1779_v61 }
 0x139   : > { %v817_v13 = vpop.f32.mrf.mxu0 }
 0x13a   : > { %v1790_v12 = vadd.f32 %v765_v10, %v717_v11  ;;  %v866_v14 = vpop.f32.mrf.mxu1  ;;  %v818_v15 = vadd.f32 %v817_v13, %v1776_v59 }
 0x13c   : > { %v1793_v16 = vadd.f32 %v866_v14, %v818_v15 }
 0x13f   : > { %v719_v17 = vpop.f32.mrf.mxu2 }
 0x140   : > { %v768_v18 = vpop.f32.mrf.mxu3  ;;  %v720_v19 = vadd.f32 %v719_v17, %v1779_v61 }
 0x141   : > { %v819_v21 = vpop.f32.mrf.mxu0 }
 0x142   : > { %v1796_v20 = vadd.f32 %v768_v18, %v720_v19  ;;  %v868_v22 = vpop.f32.mrf.mxu1  ;;  %v820_v23 = vadd.f32 %v819_v21, %v1776_v59 }
 0x144   : > { %v1799_v24 = vadd.f32 %v868_v22, %v820_v23 }
 0x147   : > { %v721_v25 = vpop.f32.mrf.mxu2 }
 0x148   : > { %v770_v26 = vpop.f32.mrf.mxu3  ;;  %v722_v27 = vadd.f32 %v721_v25, %v1779_v61 }
 0x149   : > { %v822_v29 = vpop.f32.mrf.mxu0 }
 0x14a   : > { %v1802_v28 = vadd.f32 %v770_v26, %v722_v27  ;;  %v871_v30 = vpop.f32.mrf.mxu1  ;;  %v823_v31 = vadd.f32 %v822_v29, %v1776_v59 }
 0x14c   : > { %v1805_v32 = vadd.f32 %v871_v30, %v823_v31 }
 0x14f   : > { %v724_v33 = vpop.f32.mrf.mxu2 }
 0x150   : > { %v773_v34 = vpop.f32.mrf.mxu3  ;;  %v725_v35 = vadd.f32 %v724_v33, %v1779_v61 }
 0x151   : > { %v824_v37 = vpop.f32.mrf.mxu0 }
 0x152   : > { %v1808_v36 = vadd.f32 %v773_v34, %v725_v35  ;;  %v873_v38 = vpop.f32.mrf.mxu1  ;;  %v825_v39 = vadd.f32 %v824_v37, %v1776_v59 }
 0x154   : > { %v1811_v40 = vadd.f32 %v873_v38, %v825_v39 }
 0x157   : > { %v726_v41 = vpop.f32.mrf.mxu2 }
 0x158   : > { %v775_v42 = vpop.f32.mrf.mxu3  ;;  %v727_v43 = vadd.f32 %v726_v41, %v1779_v61 }
 0x159   : > { %v827_v45 = vpop.f32.mrf.mxu0 }
 0x15a   : > { %v1814_v44 = vadd.f32 %v775_v42, %v727_v43  ;;  %v876_v46 = vpop.f32.mrf.mxu1  ;;  %v828_v47 = vadd.f32 %v827_v45, %v1776_v59 }
 0x15c   : > { %v1817_v48 = vadd.f32 %v876_v46, %v828_v47 }
 0x15f   : > { %v729_v49 = vpop.f32.mrf.mxu2 }
 0x160   : > { %v778_v50 = vpop.f32.mrf.mxu3  ;;  %v730_v51 = vadd.f32 %v729_v49, %v1779_v61 }
 0x161   : > { %v829_v53 = vpop.f32.mrf.mxu0 }
 0x162   : > { %v1820_v52 = vadd.f32 %v778_v50, %v730_v51  ;;  %v878_v54 = vpop.f32.mrf.mxu1  ;;  %v830_v55 = vadd.f32 %v829_v53, %v1776_v59 }
 0x164   : > { %v1823_v56 = vadd.f32 %v878_v54, %v830_v55 }
 0x167   : > { %v731_v57 = vpop.f32.mrf.mxu2 }
 0x168   : > { %v780_v58 = vpop.f32.mrf.mxu3  ;;  %v732_v60 = vadd.f32 %v731_v57, %v1779_v61 }
 0x169   : > { %v832_v9 = vpop.f32.mrf.mxu0 }
 0x16a   : > { %v1826_v8 = vadd.f32 %v780_v58, %v732_v60  ;;  %v881_v63 = vpop.f32.mrf.mxu1  ;;  %v833_v0 = vadd.f32 %v832_v9, %v1776_v59 }
 0x16c   : > { %v1829_v1 = vadd.f32 %v881_v63, %v833_v0 }
 0x16f   : > { %v734_v3 = vpop.f32.mrf.mxu2 }
 0x170   : > { %v783_v4 = vpop.f32.mrf.mxu3  ;;  %v735_v5 = vadd.f32 %v734_v3, %v1779_v61 }
 0x171   : > { %v834_v10 = vpop.f32.mrf.mxu0 }
 0x172   : > { %v1832_v7 = vadd.f32 %v783_v4, %v735_v5  ;;  %v883_v11 = vpop.f32.mrf.mxu1  ;;  %v835_v13 = vadd.f32 %v834_v10, %v1776_v59 }
 0x174   : > { %v1835_v14 = vadd.f32 %v883_v11, %v835_v13 }
 0x177   : > { %v736_v15 = vpop.f32.mrf.mxu2 }
 0x178   : > { %v785_v17 = vpop.f32.mrf.mxu3  ;;  %v737_v18 = vadd.f32 %v736_v15, %v1779_v61 }
 0x179   : > { %v837_v21 = vpop.f32.mrf.mxu0 }
 0x17a   : > { %v1838_v19 = vadd.f32 %v785_v17, %v737_v18  ;;  %v886_v22 = vpop.f32.mrf.mxu1 }
 0x17f   : > { %v739_v23 = vpop.f32.mrf.mxu2 }
 0x180   : > { %v1840_v25 = vpop.f32.mrf.mxu3 }
 0x181   : > { %v839_v26 = vpop.f32.mrf.mxu0 }
 0x182   : > { %v888_v27 = vpop.f32.mrf.mxu1  ;;  %v840_v15 = vadd.f32 %v839_v26, %v1776_v59 }
 0x187   : > { %v741_v29 = vpop.f32.mrf.mxu2 }
 0x188   : > { %v790_v30 = vpop.f32.mrf.mxu3 }
 0x189   : > { %v842_v31 = vpop.f32.mrf.mxu0 }
 0x18a   : > { %v891_v33 = vpop.f32.mrf.mxu1  ;;  %v843_v3 = vadd.f32 %v842_v31, %v1776_v59  ;;  %v838_v31 = vadd.f32 %v837_v21, %v1776_v59  ;;  %v920_v21 = vmax.f32 %v1835_v14, 0.0  ;;  %v1319_v14 = vld [vmem:[#allocation2] ss:$0 sm:$0xff] }
 0x18c   : > { %v892_v17 = vadd.f32 %v891_v33, %v843_v3  ;;  %v740_v33 = vadd.f32 %v739_v23, %v1779_v61  ;;  %v917_v23 = vmax.f32 %v1832_v7, 0.0  ;;  %v911_v7 = vmax.f32 %v1814_v44, 0.0 }
 0x18d   : > { %v902_v44 = vmax.f32 %v1781_v62, 0.0 }
 0x18f   : > { %v744_v34 = vpop.f32.mrf.mxu2 }
 0x190   : > { %v793_v35 = vpop.f32.mrf.mxu3 }
 0x191   : > { %v844_v37 = vpop.f32.mrf.mxu0 }
 0x192   : > { %v893_v38 = vpop.f32.mrf.mxu1  ;;  %v845_v54 = vadd.f32 %v844_v37, %v1776_v59  ;;  %v745_v37 = vadd.f32 %v744_v34, %v1779_v61 }
 0x194   : > { %v894_v4 = vadd.f32 %v893_v38, %v845_v54  ;;  %v889_v38 = vadd.f32 %v888_v27, %v840_v15 }
 0x196   : > { %v928_v18 = vmax.f32 %v894_v4, 0.0  ;;  %v924_v26 = vmax.f32 %v889_v38, 0.0 }
 0x197   : > { %v746_v39 = vpop.f32.mrf.mxu2 }
 0x198   : > { %v795_v41 = vpop.f32.mrf.mxu3  ;;  %v747_v10 = vadd.f32 %v746_v39, %v1779_v61  ;;  %v742_v39 = vadd.f32 %v741_v29, %v1779_v61  ;;  %v919_v29 = vmax.f32 %v1838_v19, 0.0  ;;  %v913_v19 = vmax.f32 %v1820_v52, 0.0 }
 0x199   : > { %v847_v42 = vpop.f32.mrf.mxu0  ;;  %v904_v52 = vmax.f32 %v1787_v6, 0.0  ;;  %v933_v6 = vld [vmem:[%s1918_s5] sm:$0xff] }
 0x19a   : > { %v896_v43 = vpop.f32.mrf.mxu1  ;;  %v848_v49 = vadd.f32 %v847_v42, %v1776_v59  ;;  %v796_v42 = vadd.f32 %v795_v41, %v747_v10 }
 0x19c   : > { %v897_v55 = vadd.f32 %v896_v43, %v848_v49  ;;  %v887_v49 = vadd.f32 %v886_v22, %v838_v31  ;;  %v918_v22 = vmax.f32 %v1829_v1, 0.0  ;;  %v912_v1 = vmax.f32 %v1811_v40, 0.0 }
 0x19d   : > { %v907_v40 = vmax.f32 %v1802_v28, 0.0 }
 0x19e   : > { %v930_v5 = vmax.f32 %v897_v55, 0.0  ;;  %v922_v41 = vmax.f32 %v887_v49, 0.0 }
 0x19f   : > { %v749_v45 = vpop.f32.mrf.mxu2 }
 0x1a0   : > { %v798_v46 = vpop.f32.mrf.mxu3  ;;  %v750_v60 = vadd.f32 %v749_v45, %v1779_v61  ;;  %v926_v45 = vmax.f32 %v892_v17, 0.0 }
 0x1a1   : > { %v849_v47 = vpop.f32.mrf.mxu0 }
 0x1a2   : > { %v850_v50 = vadd.f32 %v849_v47, %v1776_v59  ;;  %v898_v51 = vpop.f32.mrf.mxu1  ;;  %v799_v11 = vadd.f32 %v798_v46, %v750_v60  ;;  %v794_v46 = vadd.f32 %v793_v35, %v745_v37  ;;  %v927_v47 = vmax.f32 %v796_v42, 0.0 }
 0x1a3   : > { %v1388_v35 = vmov 0  }
 0x1a4   : > { %v899_v53 = vadd.f32 %v898_v51, %v850_v50  ;;  %v929_v43 = vmax.f32 %v799_v11, 0.0  ;;  %v791_v50 = vadd.f32 %v790_v30, %v742_v39  ;;  %v925_v34 = vmax.f32 %v794_v46, 0.0  ;;  %1318 = vset.pattern.permute.xlu0 %v1388_v35 }
 0x1a5   : > { %v789_v51 = vadd.f32 %v1840_v25, %v740_v33  ;;  %v914_v25 = vmax.f32 %v1817_v48, 0.0  ;;  %v915_v30 = vmax.f32 %v1826_v8, 0.0  ;;  %939 = vperm.xlu0 %1318, %v1319_v14   ;;  %v908_v48 = vmax.f32 %v1799_v24, 0.0 }
 0x1a6   : > { %v932_v57 = vmax.f32 %v899_v53, 0.0  ;;  %v923_v59 = vmax.f32 %v791_v50, 0.0  ;;  %v909_v8 = vmax.f32 %v1808_v36, 0.0  ;;  %v906_v53 = vmax.f32 %v1793_v16, 0.0  ;;  %v934_v36 = vld [vmem:[%s1918_s5 + $0x8] sm:$0xff] }
 0x1a7   : > { %v751_v58 = vpop.f32.mrf.mxu2  ;;  %v921_v27 = vmax.f32 %v789_v51, 0.0  ;;  %v903_v24 = vmax.f32 %v1790_v12, 0.0  ;;  %v901_v16 = vmax.f32 %v1784_v2, 0.0 }
 0x1a8   : > { %v752_v9 = vadd.f32 %v751_v58, %v1779_v61  ;;  %v800_v63 = vpop.f32.mrf.mxu3  ;;  %962 = vmatpush.xpose.msra.mxu3 %v932_v57  ;;  %v916_v61 = vmax.f32 %v1823_v56, 0.0  ;;  %v910_v56 = vmax.f32 %v1805_v32, 0.0  ;;  %v905_v32 = vmax.f32 %v1796_v20, 0.0 }
 0x1aa   : > { %v801_v0 = vadd.f32 %v800_v63, %v752_v9 }
 0x1ac   : > { %v931_v13 = vmax.f32 %v801_v0, 0.0  ;;  %963 = vmatpush.xpose.msra.mxu3 %v930_v5 }
 0x1ae   : > { %942 = vmatpush.xpose.msra.mxu2 %v931_v13 }
 0x1b0   : > { %964 = vmatpush.xpose.msra.mxu3 %v928_v18 }
 0x1b2   : > { %943 = vmatpush.xpose.msra.mxu2 %v929_v43 }
 0x1b4   : > { %965 = vmatpush.xpose.msra.mxu3 %v926_v45 }
 0x1b6   : > { %944 = vmatpush.xpose.msra.mxu2 %v927_v47 }
 0x1b8   : > { %966 = vmatpush.xpose.msra.mxu3 %v924_v26 }
 0x1ba   : > { %945 = vmatpush.xpose.msra.mxu2 %v925_v34 }
 0x1bc   : > { %967 = vmatpush.xpose.msra.mxu3 %v922_v41 }
 0x1be   : > { %946 = vmatpush.xpose.msra.mxu2 %v923_v59 }
 0x1c0   : > { %968 = vmatpush.xpose.msra.mxu3 %v920_v21 }
 0x1c2   : > { %947 = vmatpush.xpose.msra.mxu2 %v921_v27 }
 0x1c4   : > { %969 = vmatpush.xpose.msra.mxu3 %v918_v22 }
 0x1c6   : > { %948 = vmatpush.xpose.msra.mxu2 %v919_v29 }
 0x1c8   : > { %970 = vmatpush.xpose.msra.mxu3 %v916_v61 }
 0x1ca   : > { %949 = vmatpush.xpose.msra.mxu2 %v917_v23 }
 0x1cc   : > { %971 = vmatpush.xpose.msra.mxu3 %v914_v25 }
 0x1ce   : > { %950 = vmatpush.xpose.msra.mxu2 %v915_v30 }
 0x1d0   : > { %972 = vmatpush.xpose.msra.mxu3 %v912_v1 }
 0x1d2   : > { %951 = vmatpush.xpose.msra.mxu2 %v913_v19 }
 0x1d4   : > { %973 = vmatpush.xpose.msra.mxu3 %v910_v56 }
 0x1d6   : > { %952 = vmatpush.xpose.msra.mxu2 %v911_v7 }
 0x1d8   : > { %974 = vmatpush.xpose.msra.mxu3 %v908_v48 }
 0x1da   : > { %953 = vmatpush.xpose.msra.mxu2 %v909_v8 }
 0x1dc   : > { %975 = vmatpush.xpose.msra.mxu3 %v906_v53 }
 0x1de   : > { %954 = vmatpush.xpose.msra.mxu2 %v907_v40 }
 0x1e0   : > { %976 = vmatpush.xpose.msra.mxu3 %v904_v52 }
 0x1e2   : > { %955 = vmatpush.xpose.msra.mxu2 %v905_v32 }
 0x1e4   : > { %977 = vmatpush.xpose.msra.mxu3 %v902_v44 }
 0x1e6   : > { %956 = vmatpush.xpose.msra.mxu2 %v903_v24 }
 0x1e7   : > { %978 = vmatmul.f32.vlgmr.msra.gmra.mxu3 %v934_v36 }
 0x1ea   : > { %957 = vmatpush.xpose.msra.mxu2 %v901_v16 }
 0x1ed   : > { %958 = vmatmul.f32.vlgmr.msra.gmra.mxu2 %v933_v6 }
 0x217   : > { %v940_v62 = vpop.permute.xlu0 %939 }
 0x26a   : > { %v979_v12 = vpop.f32.mrf.mxu3 }
 0x270   : > { %v959_v20 = vpop.f32.mrf.mxu2 }
 0x271   : > { %v960_v28 = vadd.f32 %v959_v20, %v940_v62 }
 0x273   : > { %v980_v54 = vadd.f32 %v979_v12, %v960_v28 }
 0x275   : > { %v982_v55 = vand.u32 2147483647, %v980_v54  ;;  %vm988_vm1 = vcmp.ge.f32.partialorder %v980_v54, 0.0 }
 0x277   : > { %v983_v57 = vsub.f32 0.0, %v982_v55 }
 0x279   : > { %v984_v58 = vmul.f32 1.442695, %v983_v57 }
 0x27b   : > { %1320 = vpow2.f32 %v984_v58 }
 0x281   : > { %v1321_v60 = vpop.eup %1320 }
 0x282   : > { %v986_v2 = vadd.f32 1.0, %v1321_v60 }
 0x284   : > { %1322 = vrcp.f32 %v986_v2 }
 0x28a   : > { %v1323_v9 = vpop.eup %1322 }
 0x28b   : > { %v989_v63 = vmul.f32 %v1323_v9, %v1321_v60 }
 0x28d   : > { %v990_v0 = vsel %vm988_vm1, %v1323_v9, %v989_v63 }
 0x28e   : > { %991 = vst [vmem:[%s274_s16] sm:$0xff] %v990_v0 }
 0x28f   : > { %1351 = shalt.err (!%p1348_p3)
}
 0x290   : > { %1278 = dma.vmem_to_hbm [thread:$0]  (%p1470_p5), %s1006_s17, 128, %s1008_s19, %s993_s18  }
 0x291 PF: > { %p1284_p4 = scmp.ge.s32.totalorder %s1386_s29, 2  ;;  %s1019_s25 = sand.u32 1, %s1374_s26  }
 0x292   : > { %s1020_s9 = scalar_lea.sflag [#allocation4], %s1019_s25 }
 0x293   : > { %p1281_p7 = pnand %p1284_p4, %p1474_p6 }
 0x295   : > { %p1282_p8 = pneg %p1281_p7 }
 0x297   : > { %1369 = dma.done.wait (%p1282_p8), %s1020_s9, 128  }
 0x298   : > { %1371 = vsyncadd (%p1282_p8), %s1020_s9, 4294967168  ;;  %p19_p9 = scmp.ge.s32.totalorder %s1457_s8, 6   ;;  %s1923_s26 = smov %s1378_s27 }
 0x299   : > { %s1924_s27 = smov %s1382_s28  ;;  %s1925_s28 = smov %s1468_s11 }
 0x29a   : > { %s1926_s29 = smov %s1457_s8  ;;  %21 = sbr.rel (!%p19_p9) target bundleno = 6 (0x6), region = 83 }
 0x29f   :  { %1026 = vsyncpa [#allocation4], 1 }
 0x2a0   :  { %1028 = vsyncpa [#allocation4 + $0x1], 1 }

</bundles_post_ra>
